<compile_context>
chip_gen: v6e
topology: v6e:2x2x1
jax: 0.10.0
libtpu: 0.0.40
codegen_flags: <defaults>
</compile_context>

<pallas_src>
import functools

import jax
import jax.numpy as jnp
from jax import lax
from jax.experimental import pallas as pl
from jax.experimental.pallas import tpu as pltpu


def _emotion_tile_kernel(i_tbl_ref, j_tbl_ref,
                         feat_i_ref, feat_j_ref, lab_i_ref, lab_j_ref,
                         logits_ref, sim_ref, sim_sym_ref, centers_ref,
                         out_ref, *,
                         batch_size, lambda_center, lambda_soft_cosine,
                         cos_dtype):
    t = pl.program_id(0)
    i_blk = i_tbl_ref[t]
    j_blk = j_tbl_ref[t]
    is_diag = i_blk == j_blk
    is_diag_f = is_diag.astype(jnp.float32)

    TB, D = feat_i_ref.shape
    C = sim_ref.shape[0]

    # ---- validity of rows (zero-padding past the true batch size) -----------
    row_ids = lax.broadcasted_iota(jnp.int32, (TB, 1), 0)
    valid_i = (i_blk * TB + row_ids) < batch_size                     # [TB,1] bool
    valid_j = (j_blk * TB + row_ids) < batch_size
    valid_i_f = valid_i.astype(jnp.float32)

    class_ids = lax.broadcasted_iota(jnp.int32, (TB, C), 1)
    oh_i = jnp.logical_and(lab_i_ref[...] == class_ids,
                           valid_i).astype(jnp.float32)               # [TB,C]
    oh_j = jnp.logical_and(lab_j_ref[...] == class_ids,
                           valid_j).astype(jnp.float32)               # [TB,C]

    # ---- unit-normalized feature tiles; rsqrt(max(ss,1e-16)) == 1/max(||x||,1e-8)
    fi = feat_i_ref[...].astype(jnp.float32)                          # [TB,D]
    fj = feat_j_ref[...].astype(jnp.float32)
    inv_i = lax.rsqrt(jnp.maximum(jnp.sum(fi * fi, axis=-1, keepdims=True), 1e-16))
    inv_j = lax.rsqrt(jnp.maximum(jnp.sum(fj * fj, axis=-1, keepdims=True), 1e-16))
    fni = (fi * inv_i).astype(cos_dtype)
    fnj = (fj * inv_j).astype(cos_dtype)

    # ---- pairwise hinge tile: cos = fni @ fnj^T (no explicit transpose) -----
    nt = (((1,), (1,)), ((), ()))            # contract last dim of both operands
    cos = lax.dot_general(fni, fnj, dimension_numbers=nt,
                          preferred_element_type=jnp.float32)         # [TB,TB]
    hinge = jnp.maximum(1.0 - cos, 0.0)

    # Zero the in-tile diagonal on diagonal tiles (exact k == k exclusion taken
    # from the same cos values that feed the sum).
    ri = lax.broadcasted_iota(jnp.int32, (TB, TB), 0)
    ci = lax.broadcasted_iota(jnp.int32, (TB, TB), 1)
    eye = (ri == ci).astype(jnp.float32)
    hinge = hinge * (1.0 - eye * is_diag_f)

    # ---- per-class contraction:  sum_{a,b} sim_eff[l_a, l_b] * hinge[a,b]
    #      == sum( (oh_i @ sim_eff) * (hinge @ oh_j) )
    hv = jnp.dot(hinge.astype(cos_dtype), oh_j.astype(cos_dtype),
                 preferred_element_type=jnp.float32)                  # [TB,C]
    sim = sim_ref[...].astype(jnp.float32)
    sim_sym = sim_sym_ref[...].astype(jnp.float32)
    # diagonal tile -> sim; off-diagonal tile -> sim + sim^T (covers (i,j) & (j,i))
    sim_eff = sim_sym - is_diag_f * (sim_sym - sim)
    w = jnp.dot(oh_i, sim_eff, preferred_element_type=jnp.float32)    # [TB,C]

    sc_w = float(lambda_soft_cosine) / float(max(batch_size * (batch_size - 1), 1))
    partial = jnp.sum(w * hv) * sc_w

    # One lane-dense (8,128) block per step; the scalar partial sits at [0,0].
    r8 = lax.broadcasted_iota(jnp.int32, (8, 128), 0)
    c128 = lax.broadcasted_iota(jnp.int32, (8, 128), 1)
    cell00 = jnp.logical_and(r8 == 0, c128 == 0).astype(jnp.float32)
    out_ref[...] = cell00 * partial

    # ---- CE + center loss: exactly once per i-tile, on the diagonal step ----
    @pl.when(is_diag)
    def _ce_and_center():
        logits_t = logits_ref[...].astype(jnp.float32)                # [TB,C]
        m = jnp.max(logits_t, axis=-1, keepdims=True)
        lse = m + jnp.log(jnp.sum(jnp.exp(logits_t - m), axis=-1, keepdims=True))
        label_logit = jnp.sum(oh_i * logits_t, axis=-1, keepdims=True)
        ce = jnp.sum((lse - label_logit) * valid_i_f)

        centers_b = jnp.dot(oh_i, centers_ref[...].astype(jnp.float32),
                            preferred_element_type=jnp.float32)       # [TB,D]
        diff = (fi - centers_b) * valid_i_f
        cen = jnp.sum(diff * diff)

        ce_w = 1.0 / float(batch_size)
        cen_w = float(lambda_center) * 0.5 / float(batch_size)
        out_ref[...] = out_ref[...] + cell00 * (ce * ce_w + cen * cen_w)


def _vmem_capacity_bytes():
    try:
        info = pltpu.get_tpu_info()
        for name in ("vmem_capacity_bytes", "vmem_bytes", "vmem_size_bytes"):
            v = getattr(info, name, None)
            if v:
                return int(v)
    except Exception:
        pass
    return 64 * 1024 * 1024      # conservative fallback: v7x per-TensorCore VMEM


def _round_up(x, m):
    return ((x + m - 1) // m) * m


def _pick_block(batch, d, c, feat_bytes, logit_bytes, tb_cap, vmem_limit):
    """Largest power-of-two tile whose live-VMEM estimate fits the scoped limit."""
    budget = int(vmem_limit * 0.85)

    def est(tb):
        # double-buffered input windows + f32 in-kernel intermediates + margin.
        inputs = 2 * (2 * tb * d * feat_bytes + 2 * tb * 4
                      + tb * c * logit_bytes + 2 * c * c * 4 + c * d * 4)
        inter = 3 * tb * tb * 4 + 5 * tb * d * 4 + 4 * tb * c * 4
        return inputs + inter + (2 << 20)

    tb = tb_cap
    while tb > 8 and est(tb) > budget:
        tb //= 2
    return min(tb, max(8, _round_up(batch, 8)))


def emotion_constraint_loss(features, labels, logits, similarity_matrix, centers,
                            lambda_center=1.0, lambda_soft_cosine=1.0,
                            block_b=None, cosine_matmul_dtype=jnp.bfloat16):
    """Pallas TPU forward of EmotionConstraintLoss.

    cosine_matmul_dtype=jnp.bfloat16 (default) feeds the dominant matmuls with
    bf16 MXU inputs (f32 accumulation, ~1e-3 relative error on the soft-cosine
    term); pass jnp.float32 for bit-accurate results.
    """
    B, D = features.shape
    C = similarity_matrix.shape[0]

    # ---- generation-aware tile size & scoped-VMEM request -------------------
    vmem_phys = _vmem_capacity_bytes()
    if vmem_phys >= 100 * 1024 * 1024:        # v5e / v6e: 128 MiB VMEM
        tb_cap, vmem_limit = 1024, 96 * 1024 * 1024
    else:                                     # v7x: 64 MiB VMEM per TensorCore
        tb_cap, vmem_limit = 512, 48 * 1024 * 1024
    vmem_limit = max(16 * 1024 * 1024,
                     min(vmem_limit, int(vmem_phys * 0.75), 128 * 1024 * 1024))

    if block_b is None:
        block_b = _pick_block(B, D, C, features.dtype.itemsize,
                              logits.dtype.itemsize, tb_cap, vmem_limit)
    TB = max(8, _round_up(int(block_b), 8))
    nb = -(-B // TB)
    B_pad = nb * TB

    labels2d = labels.astype(jnp.int32).reshape(B, 1)
    if B_pad != B:
        pad = B_pad - B
        features_p = jnp.pad(features, ((0, pad), (0, 0)))
        labels_p = jnp.pad(labels2d, ((0, pad), (0, 0)))
        logits_p = jnp.pad(logits, ((0, pad), (0, 0)))
    else:
        features_p, labels_p, logits_p = features, labels2d, logits

    # Triangular (i <= j) tile enumeration, row-major so the i-tile block index
    # stays constant across consecutive steps (Pallas skips unchanged-block DMAs).
    ii = [a for a in range(nb) for b in range(a, nb)]
    jj = [b for a in range(nb) for b in range(a, nb)]
    n_steps = len(ii)
    i_tbl = jnp.asarray(ii, dtype=jnp.int32)
    j_tbl = jnp.asarray(jj, dtype=jnp.int32)

    sim_sym = similarity_matrix + jnp.transpose(similarity_matrix)

    kernel = functools.partial(
        _emotion_tile_kernel,
        batch_size=B,
        lambda_center=float(lambda_center),
        lambda_soft_cosine=float(lambda_soft_cosine),
        cos_dtype=cosine_matmul_dtype)

    fbytes = features.dtype.itemsize
    lbytes = logits.dtype.itemsize
    sbytes = similarity_matrix.dtype.itemsize
    cbytes = centers.dtype.itemsize
    # Real streamed traffic: feature tiles are re-read once per triangular step.
    bytes_accessed = int(
        n_steps * (2 * TB * D * fbytes + 2 * TB * 4 + TB * C * lbytes
                   + 2 * C * C * sbytes + C * D * cbytes)
        + n_steps * 8 * 128 * 4)
    flops = int(n_steps * (2 * TB * TB * (D + C) + 2 * TB * C * C + 5 * TB * TB)
                + nb * 2 * TB * C * D)
    transcend = int(B_pad * C + 2 * TB * n_steps + nb * TB)
    cost = pl.CostEstimate(flops=flops, transcendentals=transcend,
                           bytes_accessed=bytes_accessed)

    grid_spec = pltpu.PrefetchScalarGridSpec(
        num_scalar_prefetch=2,
        grid=(n_steps,),
        in_specs=[
            pl.BlockSpec((TB, D), lambda t, it, jt: (it[t], 0)),   # features, i tile
            pl.BlockSpec((TB, D), lambda t, it, jt: (jt[t], 0)),   # features, j tile
            pl.BlockSpec((TB, 1), lambda t, it, jt: (it[t], 0)),   # labels,   i tile
            pl.BlockSpec((TB, 1), lambda t, it, jt: (jt[t], 0)),   # labels,   j tile
            pl.BlockSpec((TB, C), lambda t, it, jt: (it[t], 0)),   # logits,   i tile
            pl.BlockSpec((C, C), lambda t, it, jt: (0, 0)),        # similarity
            pl.BlockSpec((C, C), lambda t, it, jt: (0, 0)),        # sim + sim^T
            pl.BlockSpec((C, D), lambda t, it, jt: (0, 0)),        # centers
        ],
        # One lane-dense (8,128) block per step -> disjoint writes, so the grid
        # axis can be "parallel" (sharded across TensorCores on v7x).
        out_specs=pl.BlockSpec((8, 128), lambda t, it, jt: (t, 0)),
    )

    partials = pl.pallas_call(
        kernel,
        out_shape=jax.ShapeDtypeStruct((8 * n_steps, 128), jnp.float32),
        grid_spec=grid_spec,
        compiler_params=pltpu.CompilerParams(
            dimension_semantics=("parallel",),
            vmem_limit_bytes=int(vmem_limit)),
        cost_estimate=cost,
    )(i_tbl, j_tbl, features_p, features_p, labels_p, labels_p, logits_p,
      similarity_matrix, sim_sym, centers)

    # Every non-[0,0]-per-block entry is exactly zero, so a flat sum is exact.
    return jnp.sum(partials)


def _reference_loss(features, labels, logits, similarity_matrix, centers,
                    lambda_center=1.0, lambda_soft_cosine=1.0):
    # Pure-JAX reference mirroring the PyTorch forward exactly.
    B = features.shape[0]
    log_probs = jax.nn.log_softmax(logits, axis=-1)
    ce = -jnp.mean(jnp.take_along_axis(log_probs, labels[:, None], axis=1))
    cb = centers[labels]
    center_loss = jnp.sum((features - cb) ** 2) / 2.0 / B
    norms = jnp.maximum(jnp.linalg.norm(features, axis=-1, keepdims=True), 1e-8)
    fn = features / norms
    cos = fn @ fn.T
    sim_lab = similarity_matrix[labels][:, labels]
    offdiag = 1.0 - jnp.eye(B)
    soft = jnp.sum(sim_lab * jnp.maximum(1.0 - cos, 0.0) * offdiag) / (B * (B - 1))
    return ce + lambda_center * center_loss + lambda_soft_cosine * soft


if __name__ == "__main__":
    num_classes = 4
    feature_dim = 32
    batch = 8

    key = jax.random.PRNGKey(0)
    k_feat, k_lab, k_logit, k_sim, k_cent = jax.random.split(key, 5)

    features = jax.random.normal(k_feat, (batch, feature_dim), jnp.float32)
    labels = jax.random.randint(k_lab, (batch,), 0, num_classes, jnp.int32)
    logits = jax.random.normal(k_logit, (batch, num_classes), jnp.float32)
    similarity_matrix = jax.random.uniform(k_sim, (num_classes, num_classes),
                                           jnp.float32)
    # deterministic stand-in for nn.Parameter(torch.randn(num_classes, feature_dim))
    centers = jax.random.normal(k_cent, (num_classes, feature_dim), jnp.float32)

    ref = _reference_loss(features, labels, logits, similarity_matrix, centers)

    # exact path (f32 MXU inputs): tight check
    loss_f32 = emotion_constraint_loss(features, labels, logits,
                                       similarity_matrix, centers,
                                       cosine_matmul_dtype=jnp.float32)
    loss_f32 = jax.block_until_ready(loss_f32)
    assert jnp.allclose(loss_f32, ref, rtol=1e-5, atol=1e-5), (loss_f32, ref)

    # default fast path (bf16 MXU inputs, f32 accumulation): loose check
    loss_bf16 = jax.block_until_ready(
        emotion_constraint_loss(features, labels, logits, similarity_matrix,
                                centers))
    assert jnp.allclose(loss_bf16, ref, rtol=5e-2, atol=5e-2), (loss_bf16, ref)

    # ragged batch -> zero-padding + masking, multi-tile triangular grid
    batch2 = 10
    k_feat2, k_lab2, k_logit2 = jax.random.split(jax.random.PRNGKey(1), 3)
    features2 = jax.random.normal(k_feat2, (batch2, feature_dim), jnp.float32)
    labels2 = jax.random.randint(k_lab2, (batch2,), 0, num_classes, jnp.int32)
    logits2 = jax.random.normal(k_logit2, (batch2, num_classes), jnp.float32)
    ref2 = _reference_loss(features2, labels2, logits2, similarity_matrix, centers)
    loss2 = jax.block_until_ready(
        emotion_constraint_loss(features2, labels2, logits2, similarity_matrix,
                                centers, block_b=8,
                                cosine_matmul_dtype=jnp.float32))
    assert jnp.allclose(loss2, ref2, rtol=1e-5, atol=1e-5), (loss2, ref2)

    print("KERNEL_OK")
</pallas_src>

<mosaic_0001>
module attributes {stable_mosaic.version = 11 : i64} {
  func.func @_emotion_tile_kernel(%arg0: i32, %arg1: memref<1xi32, #tpu.memory_space<smem>>, %arg2: memref<1xi32, #tpu.memory_space<smem>>, %arg3: memref<8x32xf32, #tpu.memory_space<vmem>>, %arg4: memref<8x32xf32, #tpu.memory_space<vmem>>, %arg5: memref<8x1xi32, #tpu.memory_space<vmem>>, %arg6: memref<8x1xi32, #tpu.memory_space<vmem>>, %arg7: memref<8x4xf32, #tpu.memory_space<vmem>>, %arg8: memref<4x4xf32, #tpu.memory_space<vmem>>, %arg9: memref<4x4xf32, #tpu.memory_space<vmem>>, %arg10: memref<4x32xf32, #tpu.memory_space<vmem>>, %arg11: memref<8x128xf32, #tpu.memory_space<vmem>>) attributes {dimension_semantics = [#tpu.dimension_semantics<parallel>], iteration_bounds = array<i64: 1>, scalar_prefetch = 2 : i64, scratch_operands = 0 : i64, tpu.core_type = #tpu.core_type<tc>, window_params = [{transform_indices = @transform_0, window_bounds = array<i64: 8, 32>}, {transform_indices = @transform_1, window_bounds = array<i64: 8, 32>}, {transform_indices = @transform_2, window_bounds = array<i64: 8, 1>}, {transform_indices = @transform_3, window_bounds = array<i64: 8, 1>}, {transform_indices = @transform_4, window_bounds = array<i64: 8, 4>}, {pipeline_mode = #tpu.pipeline_mode<synchronous>, transform_indices = @transform_5, window_bounds = array<i64: 4, 4>}, {pipeline_mode = #tpu.pipeline_mode<synchronous>, transform_indices = @transform_6, window_bounds = array<i64: 4, 4>}, {pipeline_mode = #tpu.pipeline_mode<synchronous>, transform_indices = @transform_7, window_bounds = array<i64: 4, 32>}, {transform_indices = @transform_8, window_bounds = array<i64: 8, 128>}]} {
    %0 = arith.index_cast %arg0 : i32 to index
    %1 = memref.load %arg1[%0] : memref<1xi32, #tpu.memory_space<smem>>
    %2 = arith.index_cast %arg0 : i32 to index
    %3 = memref.load %arg2[%2] : memref<1xi32, #tpu.memory_space<smem>>
    %4 = arith.cmpi eq, %1, %3 : i32
    %5 = arith.extui %4 : i1 to i32
    %6 = arith.sitofp %5 : i32 to f32
    %7 = tpu.iota {dimensions = array<i32: 0>} : vector<8x1xi32>
    %c8_i32 = arith.constant 8 : i32
    %8 = arith.muli %1, %c8_i32 : i32
    %9 = vector.broadcast %8 : i32 to vector<8x1xi32>
    %10 = arith.addi %9, %7 : vector<8x1xi32>
    %c8_i32_0 = arith.constant 8 : i32
    %11 = vector.broadcast %c8_i32_0 : i32 to vector<8x1xi32>
    %12 = arith.cmpi slt, %10, %11 : vector<8x1xi32>
    %c8_i32_1 = arith.constant 8 : i32
    %13 = arith.muli %3, %c8_i32_1 : i32
    %14 = vector.broadcast %13 : i32 to vector<8x1xi32>
    %15 = arith.addi %14, %7 : vector<8x1xi32>
    %c8_i32_2 = arith.constant 8 : i32
    %16 = vector.broadcast %c8_i32_2 : i32 to vector<8x1xi32>
    %17 = arith.cmpi slt, %15, %16 : vector<8x1xi32>
    %18 = arith.extui %12 : vector<8x1xi1> to vector<8x1xi32>
    %19 = arith.sitofp %18 : vector<8x1xi32> to vector<8x1xf32>
    %20 = tpu.iota {dimensions = array<i32: 1>} : vector<8x4xi32>
    %c0 = arith.constant 0 : index
    %c0_3 = arith.constant 0 : index
    %21 = vector.load %arg5[%c0, %c0_3] : memref<8x1xi32, #tpu.memory_space<vmem>>, vector<8x1xi32>
    %22 = vector.broadcast %21 : vector<8x1xi32> to vector<8x4xi32>
    %23 = arith.cmpi eq, %22, %20 : vector<8x4xi32>
    %24 = vector.broadcast %12 : vector<8x1xi1> to vector<8x4xi1>
    %25 = arith.andi %23, %24 : vector<8x4xi1>
    %26 = arith.extui %25 : vector<8x4xi1> to vector<8x4xi32>
    %27 = arith.sitofp %26 : vector<8x4xi32> to vector<8x4xf32>
    %c0_4 = arith.constant 0 : index
    %c0_5 = arith.constant 0 : index
    %28 = vector.load %arg6[%c0_4, %c0_5] : memref<8x1xi32, #tpu.memory_space<vmem>>, vector<8x1xi32>
    %29 = vector.broadcast %28 : vector<8x1xi32> to vector<8x4xi32>
    %30 = arith.cmpi eq, %29, %20 : vector<8x4xi32>
    %31 = vector.broadcast %17 : vector<8x1xi1> to vector<8x4xi1>
    %32 = arith.andi %30, %31 : vector<8x4xi1>
    %33 = arith.extui %32 : vector<8x4xi1> to vector<8x4xi32>
    %34 = arith.sitofp %33 : vector<8x4xi32> to vector<8x4xf32>
    %c0_6 = arith.constant 0 : index
    %c0_7 = arith.constant 0 : index
    %35 = vector.load %arg3[%c0_6, %c0_7] : memref<8x32xf32, #tpu.memory_space<vmem>>, vector<8x32xf32>
    %c0_8 = arith.constant 0 : index
    %c0_9 = arith.constant 0 : index
    %36 = vector.load %arg4[%c0_8, %c0_9] : memref<8x32xf32, #tpu.memory_space<vmem>>, vector<8x32xf32>
    %37 = arith.mulf %35, %35 : vector<8x32xf32>
    %cst = arith.constant dense<0.000000e+00> : vector<8xf32>
    %38 = vector.multi_reduction <add>, %37, %cst [1] : vector<8x32xf32> to vector<8xf32>
    %39 = vector.shape_cast %38 : vector<8xf32> to vector<8x1xf32>
    %cst_10 = arith.constant 1.000000e-16 : f32
    %40 = vector.broadcast %cst_10 : f32 to vector<8x1xf32>
    %41 = arith.maximumf %39, %40 : vector<8x1xf32>
    %42 = math.rsqrt %41 : vector<8x1xf32>
    %43 = arith.mulf %36, %36 : vector<8x32xf32>
    %cst_11 = arith.constant dense<0.000000e+00> : vector<8xf32>
    %44 = vector.multi_reduction <add>, %43, %cst_11 [1] : vector<8x32xf32> to vector<8xf32>
    %45 = vector.shape_cast %44 : vector<8xf32> to vector<8x1xf32>
    %cst_12 = arith.constant 1.000000e-16 : f32
    %46 = vector.broadcast %cst_12 : f32 to vector<8x1xf32>
    %47 = arith.maximumf %45, %46 : vector<8x1xf32>
    %48 = math.rsqrt %47 : vector<8x1xf32>
    %49 = vector.broadcast %42 : vector<8x1xf32> to vector<8x32xf32>
    %50 = arith.mulf %35, %49 : vector<8x32xf32>
    %51 = vector.broadcast %48 : vector<8x1xf32> to vector<8x32xf32>
    %52 = arith.mulf %36, %51 : vector<8x32xf32>
    %cst_13 = arith.constant dense<0.000000e+00> : vector<8x8xf32>
    %53 = tpu.matmul %50, %52, %cst_13 {dimension_numbers = #tpu.dot_dimension_numbers<[1], [1], [0], [0], [0, 0, 1, 0], [], []>} : vector<8x32xf32>, vector<8x32xf32>, vector<8x8xf32> -> vector<8x8xf32>
    %cst_14 = arith.constant 1.000000e+00 : f32
    %54 = vector.broadcast %cst_14 : f32 to vector<8x8xf32>
    %55 = arith.subf %54, %53 : vector<8x8xf32>
    %cst_15 = arith.constant 0.000000e+00 : f32
    %56 = vector.broadcast %cst_15 : f32 to vector<8x8xf32>
    %57 = arith.maximumf %55, %56 : vector<8x8xf32>
    %58 = tpu.iota {dimensions = array<i32: 0>} : vector<8x8xi32>
    %59 = tpu.iota {dimensions = array<i32: 1>} : vector<8x8xi32>
    %60 = arith.cmpi eq, %58, %59 : vector<8x8xi32>
    %61 = arith.extui %60 : vector<8x8xi1> to vector<8x8xi32>
    %62 = arith.sitofp %61 : vector<8x8xi32> to vector<8x8xf32>
    %63 = vector.broadcast %6 : f32 to vector<8x8xf32>
    %64 = arith.mulf %62, %63 : vector<8x8xf32>
    %cst_16 = arith.constant 1.000000e+00 : f32
    %65 = vector.broadcast %cst_16 : f32 to vector<8x8xf32>
    %66 = arith.subf %65, %64 : vector<8x8xf32>
    %67 = arith.mulf %57, %66 : vector<8x8xf32>
    %cst_17 = arith.constant dense<0.000000e+00> : vector<8x4xf32>
    %68 = tpu.matmul %67, %34, %cst_17 {dimension_numbers = #tpu.dot_dimension_numbers<[1], [0], [0], [1], [0, 0, 1, 1], [], []>} : vector<8x8xf32>, vector<8x4xf32>, vector<8x4xf32> -> vector<8x4xf32>
    %c0_18 = arith.constant 0 : index
    %c0_19 = arith.constant 0 : index
    %69 = vector.load %arg8[%c0_18, %c0_19] : memref<4x4xf32, #tpu.memory_space<vmem>>, vector<4x4xf32>
    %c0_20 = arith.constant 0 : index
    %c0_21 = arith.constant 0 : index
    %70 = vector.load %arg9[%c0_20, %c0_21] : memref<4x4xf32, #tpu.memory_space<vmem>>, vector<4x4xf32>
    %71 = arith.subf %70, %69 : vector<4x4xf32>
    %72 = vector.broadcast %6 : f32 to vector<4x4xf32>
    %73 = arith.mulf %72, %71 : vector<4x4xf32>
    %74 = arith.subf %70, %73 : vector<4x4xf32>
    %cst_22 = arith.constant dense<0.000000e+00> : vector<8x4xf32>
    %75 = tpu.matmul %27, %74, %cst_22 {dimension_numbers = #tpu.dot_dimension_numbers<[1], [0], [0], [1], [0, 0, 1, 1], [], []>} : vector<8x4xf32>, vector<4x4xf32>, vector<8x4xf32> -> vector<8x4xf32>
    %76 = arith.mulf %75, %68 : vector<8x4xf32>
    %77 = vector.shape_cast %76 : vector<8x4xf32> to vector<1x8x4xf32>
    %cst_23 = arith.constant dense<0.000000e+00> : vector<1xf32>
    %78 = vector.multi_reduction <add>, %77, %cst_23 [1, 2] : vector<1x8x4xf32> to vector<1xf32>
    %79 = vector.shape_cast %78 : vector<1xf32> to vector<1x1x1xf32>
    %80 = vector.extract %79[0, 0, 0] : f32 from vector<1x1x1xf32>
    %cst_24 = arith.constant 0.0178571437 : f32
    %81 = arith.mulf %80, %cst_24 : f32
    %82 = tpu.iota {dimensions = array<i32: 0>} : vector<8x128xi32>
    %83 = tpu.iota {dimensions = array<i32: 1>} : vector<8x128xi32>
    %c0_i32 = arith.constant 0 : i32
    %84 = vector.broadcast %c0_i32 : i32 to vector<8x128xi32>
    %85 = arith.cmpi eq, %82, %84 : vector<8x128xi32>
    %c0_i32_25 = arith.constant 0 : i32
    %86 = vector.broadcast %c0_i32_25 : i32 to vector<8x128xi32>
    %87 = arith.cmpi eq, %83, %86 : vector<8x128xi32>
    %88 = arith.andi %85, %87 : vector<8x128xi1>
    %89 = arith.extui %88 : vector<8x128xi1> to vector<8x128xi32>
    %90 = arith.sitofp %89 : vector<8x128xi32> to vector<8x128xf32>
    %91 = vector.broadcast %81 : f32 to vector<8x128xf32>
    %92 = arith.mulf %90, %91 : vector<8x128xf32>
    %c0_26 = arith.constant 0 : index
    %c0_27 = arith.constant 0 : index
    %93 = vector.load %arg11[%c0_26, %c0_27] : memref<8x128xf32, #tpu.memory_space<vmem>>, vector<8x128xf32>
    tpu.vector_store %arg11[%c0_26, %c0_27], %92 {strides = array<i32>} : memref<8x128xf32, #tpu.memory_space<vmem>>, vector<8x128xf32>,
    %94 = arith.extui %4 : i1 to i32
    %c0_i32_28 = arith.constant 0 : i32
    %95 = arith.cmpi ne, %94, %c0_i32_28 : i32
    scf.if %95 {
      %c0_29 = arith.constant 0 : index
      %c0_30 = arith.constant 0 : index
      %96 = vector.load %arg7[%c0_29, %c0_30] : memref<8x4xf32, #tpu.memory_space<vmem>>, vector<8x4xf32>
      %cst_31 = arith.constant dense<0xFF800000> : vector<8xf32>
      %97 = vector.multi_reduction <maximumf>, %96, %cst_31 [1] : vector<8x4xf32> to vector<8xf32>
      %98 = vector.shape_cast %97 : vector<8xf32> to vector<8x1xf32>
      %99 = vector.broadcast %98 : vector<8x1xf32> to vector<8x4xf32>
      %100 = arith.subf %96, %99 : vector<8x4xf32>
      %101 = math.exp %100 : vector<8x4xf32>
      %cst_32 = arith.constant dense<0.000000e+00> : vector<8xf32>
      %102 = vector.multi_reduction <add>, %101, %cst_32 [1] : vector<8x4xf32> to vector<8xf32>
      %103 = vector.shape_cast %102 : vector<8xf32> to vector<8x1xf32>
      %104 = math.log %103 : vector<8x1xf32>
      %105 = arith.addf %98, %104 : vector<8x1xf32>
      %106 = arith.mulf %27, %96 : vector<8x4xf32>
      %cst_33 = arith.constant dense<0.000000e+00> : vector<8xf32>
      %107 = vector.multi_reduction <add>, %106, %cst_33 [1] : vector<8x4xf32> to vector<8xf32>
      %108 = vector.shape_cast %107 : vector<8xf32> to vector<8x1xf32>
      %109 = arith.subf %105, %108 : vector<8x1xf32>
      %110 = arith.mulf %109, %19 : vector<8x1xf32>
      %111 = vector.shape_cast %110 : vector<8x1xf32> to vector<1x8x1xf32>
      %cst_34 = arith.constant dense<0.000000e+00> : vector<1xf32>
      %112 = vector.multi_reduction <add>, %111, %cst_34 [1, 2] : vector<1x8x1xf32> to vector<1xf32>
      %113 = vector.shape_cast %112 : vector<1xf32> to vector<1x1x1xf32>
      %114 = vector.extract %113[0, 0, 0] : f32 from vector<1x1x1xf32>
      %c0_35 = arith.constant 0 : index
      %c0_36 = arith.constant 0 : index
      %115 = vector.load %arg10[%c0_35, %c0_36] : memref<4x32xf32, #tpu.memory_space<vmem>>, vector<4x32xf32>
      %cst_37 = arith.constant dense<0.000000e+00> : vector<8x32xf32>
      %116 = tpu.matmul %27, %115, %cst_37 {dimension_numbers = #tpu.dot_dimension_numbers<[1], [0], [0], [1], [0, 0, 1, 1], [], []>} : vector<8x4xf32>, vector<4x32xf32>, vector<8x32xf32> -> vector<8x32xf32>
      %117 = arith.subf %35, %116 : vector<8x32xf32>
      %118 = vector.broadcast %19 : vector<8x1xf32> to vector<8x32xf32>
      %119 = arith.mulf %117, %118 : vector<8x32xf32>
      %120 = arith.mulf %119, %119 : vector<8x32xf32>
      %121 = vector.shape_cast %120 : vector<8x32xf32> to vector<1x8x32xf32>
      %cst_38 = arith.constant dense<0.000000e+00> : vector<1xf32>
      %122 = vector.multi_reduction <add>, %121, %cst_38 [1, 2] : vector<1x8x32xf32> to vector<1xf32>
      %123 = vector.shape_cast %122 : vector<1xf32> to vector<1x1x1xf32>
      %124 = vector.extract %123[0, 0, 0] : f32 from vector<1x1x1xf32>
      %c0_39 = arith.constant 0 : index
      %c0_40 = arith.constant 0 : index
      %125 = vector.load %arg11[%c0_39, %c0_40] : memref<8x128xf32, #tpu.memory_space<vmem>>, vector<8x128xf32>
      %cst_41 = arith.constant 1.250000e-01 : f32
      %126 = arith.mulf %114, %cst_41 : f32
      %cst_42 = arith.constant 6.250000e-02 : f32
      %127 = arith.mulf %124, %cst_42 : f32
      %128 = arith.addf %126, %127 : f32
      %129 = vector.broadcast %128 : f32 to vector<8x128xf32>
      %130 = arith.mulf %90, %129 : vector<8x128xf32>
      %131 = arith.addf %125, %130 : vector<8x128xf32>
      %c0_43 = arith.constant 0 : index
      %c0_44 = arith.constant 0 : index
      %132 = vector.load %arg11[%c0_43, %c0_44] : memref<8x128xf32, #tpu.memory_space<vmem>>, vector<8x128xf32>
      tpu.vector_store %arg11[%c0_43, %c0_44], %131 {strides = array<i32>} : memref<8x128xf32, #tpu.memory_space<vmem>>, vector<8x128xf32>,
    } else {
    }
    return
  }
  func.func @transform_0(%arg0: i32, %arg1: memref<1xi32, #tpu.memory_space<smem>>, %arg2: memref<1xi32, #tpu.memory_space<smem>>) -> (i32, i32) {
    %0 = arith.index_cast %arg0 : i32 to index
    %1 = memref.load %arg1[%0] : memref<1xi32, #tpu.memory_space<smem>>
    %c0_i32 = arith.constant 0 : i32
    %c0_i32_0 = arith.constant 0 : i32
    return %1, %c0_i32 : i32, i32
  }
  func.func @transform_1(%arg0: i32, %arg1: memref<1xi32, #tpu.memory_space<smem>>, %arg2: memref<1xi32, #tpu.memory_space<smem>>) -> (i32, i32) {
    %0 = arith.index_cast %arg0 : i32 to index
    %1 = memref.load %arg2[%0] : memref<1xi32, #tpu.memory_space<smem>>
    %c0_i32 = arith.constant 0 : i32
    %c0_i32_0 = arith.constant 0 : i32
    return %1, %c0_i32 : i32, i32
  }
  func.func @transform_2(%arg0: i32, %arg1: memref<1xi32, #tpu.memory_space<smem>>, %arg2: memref<1xi32, #tpu.memory_space<smem>>) -> (i32, i32) {
    %0 = arith.index_cast %arg0 : i32 to index
    %1 = memref.load %arg1[%0] : memref<1xi32, #tpu.memory_space<smem>>
    %c0_i32 = arith.constant 0 : i32
    %c0_i32_0 = arith.constant 0 : i32
    return %1, %c0_i32 : i32, i32
  }
  func.func @transform_3(%arg0: i32, %arg1: memref<1xi32, #tpu.memory_space<smem>>, %arg2: memref<1xi32, #tpu.memory_space<smem>>) -> (i32, i32) {
    %0 = arith.index_cast %arg0 : i32 to index
    %1 = memref.load %arg2[%0] : memref<1xi32, #tpu.memory_space<smem>>
    %c0_i32 = arith.constant 0 : i32
    %c0_i32_0 = arith.constant 0 : i32
    return %1, %c0_i32 : i32, i32
  }
  func.func @transform_4(%arg0: i32, %arg1: memref<1xi32, #tpu.memory_space<smem>>, %arg2: memref<1xi32, #tpu.memory_space<smem>>) -> (i32, i32) {
    %0 = arith.index_cast %arg0 : i32 to index
    %1 = memref.load %arg1[%0] : memref<1xi32, #tpu.memory_space<smem>>
    %c0_i32 = arith.constant 0 : i32
    %c0_i32_0 = arith.constant 0 : i32
    return %1, %c0_i32 : i32, i32
  }
  func.func @transform_5(%arg0: i32, %arg1: memref<1xi32, #tpu.memory_space<smem>>, %arg2: memref<1xi32, #tpu.memory_space<smem>>) -> (i32, i32) {
    %c0_i32 = arith.constant 0 : i32
    %c0_i32_0 = arith.constant 0 : i32
    %c0_i32_1 = arith.constant 0 : i32
    return %c0_i32, %c0_i32_0 : i32, i32
  }
  func.func @transform_6(%arg0: i32, %arg1: memref<1xi32, #tpu.memory_space<smem>>, %arg2: memref<1xi32, #tpu.memory_space<smem>>) -> (i32, i32) {
    %c0_i32 = arith.constant 0 : i32
    %c0_i32_0 = arith.constant 0 : i32
    %c0_i32_1 = arith.constant 0 : i32
    return %c0_i32, %c0_i32_0 : i32, i32
  }
  func.func @transform_7(%arg0: i32, %arg1: memref<1xi32, #tpu.memory_space<smem>>, %arg2: memref<1xi32, #tpu.memory_space<smem>>) -> (i32, i32) {
    %c0_i32 = arith.constant 0 : i32
    %c0_i32_0 = arith.constant 0 : i32
    %c0_i32_1 = arith.constant 0 : i32
    return %c0_i32, %c0_i32_0 : i32, i32
  }
  func.func @transform_8(%arg0: i32, %arg1: memref<1xi32, #tpu.memory_space<smem>>, %arg2: memref<1xi32, #tpu.memory_space<smem>>) -> (i32, i32) {
    %c0_i32 = arith.constant 0 : i32
    %c0_i32_0 = arith.constant 0 : i32
    return %arg0, %c0_i32 : i32, i32
  }
}

</mosaic_0001>

<bundles_post_ra>
// kernel: tpu_custom_call.1
= control target key start
LH: loop header
LB: loop body
LE: loop exit
PB: predicated region body
PF: predicated region fallthrough
CT: control target
= control target key end

     0   :  { %s873_s0 = inlined_call_operand.<no memory space> [shape: s32[1], index: 0, kind: input, shape index: {}]   ;;  %s874_s1 = inlined_call_operand.<no memory space> [shape: s32[1], index: 1, kind: input, shape index: {}]   ;;  %s875_s2 = inlined_call_operand.vmem [shape: f32[8,32], index: 2, kind: input, shape index: {}]   ;;  %s876_s3 = inlined_call_operand.vmem [shape: f32[8,32], index: 3, kind: input, shape index: {}]   ;;  %s877_s4 = inlined_call_operand.vmem [shape: s32[8,1], index: 4, kind: input, shape index: {}]   ;;  %s878_s5 = inlined_call_operand.vmem [shape: s32[8,1], index: 5, kind: input, shape index: {}]   ;;  %s879_s6 = inlined_call_operand.vmem [shape: f32[8,4], index: 6, kind: input, shape index: {}]   ;;  %s880_s7 = inlined_call_operand.vmem [shape: f32[4,4], index: 7, kind: input, shape index: {}]   ;;  %s881_s8 = inlined_call_operand.vmem [shape: f32[4,4], index: 8, kind: input, shape index: {}]   ;;  %s882_s9 = inlined_call_operand.vmem [shape: f32[4,32], index: 9, kind: input, shape index: {}]   ;;  %s883_s10 = inlined_call_operand.hbm [shape: f32[8,128], index: 10, kind: output, shape index: {}]  }
   0x1   :  { %p96_p0 = scmp.lt.s32.totalorder %s874_s1, 0  ;;  %p90_p1 = scmp.lt.s32.totalorder %s873_s0, 0 }
   0x2   :  { %17 = vsyncpa [#allocation6], 0  ;;  %vm160_vm0 = vcmask 261120   ;;  %v702_v6 = vmov 0.0   ;;  %vm703_vm1 = vmmov 0   ;;  %v704_v7 = vmov 0   ;;  %p121_p2 = scmp.eq.s32.totalorder %s873_s0, %s874_s1  ;;  %p626_p3 = scmp.ne.s32.totalorder %s873_s0, %s874_s1 }
   0x3   :  { %s97_s19 = scalar_select %p96_p0, %s874_s1, 0  ;;  %637 = vmatprep.subr.mxu0 %v702_v6  ;;  %642 = vmatprep.subr.mxu1 %v702_v6  ;;  %v124_v18 = vlaneseq  ;;  %v705_v27 = vmov 1.0   ;;  %v333_v28 = vld [vmem:[%s880_s7] sm:$0xf]  ;;  %vm259_vm8 = vcmask 64512   ;;  %vm342_vm9 = vcmask 1043456  }
   0x4   :  { %s91_s22 = scalar_select %p90_p1, %s873_s0, 0  ;;  %639 = vmatprep.mubr.msk.f32.mxu0 %vm703_vm1, %v702_v6  ;;  %644 = vmatprep.mubr.msk.f32.mxu1 %vm703_vm1, %v702_v6  ;;  %v334_v29 = vld [vmem:[%s881_s8] sm:$0xf]  ;;  %vm338_vm11 = vcmask 31744  }
   0x5   :  { %s609_s23 = sshll.u32 %s97_s19, 3  ;;  %670 = vset.pattern.permute.xlu1 %v704_v7  ;;  %671 = vset.pattern.permute.xlu0 %v704_v7  ;;  %s614_s18 = sshll.u32 %s874_s1, 3  ;;  %v125_v20 = vshrl.u32 %v124_v18, 7  ;;  %v137_v22 = vand.u32 127, %v124_v18  ;;  %v335_v32 = vsub.f32 %v334_v29, %v333_v28 }
   0x6   :  { %s99_s26 = scalar_lea.vmem %s876_s3, %s609_s23  ;;  %s779_s27 = sshll.u32 %s91_s22, 3  ;;  %v131_v19 = vstv %s614_s18 }
   0x7   :  { %v158_v0 = vld [vmem:[%s99_s26] sm:$0xff]  ;;  %s93_s30 = scalar_lea.vmem %s875_s2, %s779_s27  ;;  %s117_s13 = scalar_lea.vmem %s879_s6, %s779_s27  ;;  %v132_v21 = vadd.s32 %v131_v19, %v125_v20  ;;  %vm252_vm6 = vcmp.eq.s32.totalorder %v125_v20, %v137_v22  ;;  %vm428_vm12 = vcmp.eq.s32.totalorder %v125_v20, 0  ;;  %vm429_vm13 = vcmp.eq.s32.totalorder %v137_v22, 0 }
   0x8   :  { %v166_v1 = vmul.f32 %v158_v0, %v158_v0  ;;  %v789_v2 = vld [vmem:[%s93_s30] sm:$0xff]  ;;  %s111_s14 = scalar_lea.vmem %s878_s5, %s609_s23  ;;  %s105_s17 = scalar_lea.vmem %s877_s4, %s779_s27  ;;  %v620_v30 = vsel %vm252_vm6, 1.0, %v702_v6  ;;  %vm430_vm14 = vmand %vm428_vm12, %vm429_vm13 }
   0x9   :  { %v159_v3 = vmul.f32 %v789_v2, %v789_v2  ;;  %v147_v8 = vld [vmem:[%s111_s14] sm:$0xff]  ;;  %vm133_vm2 = vcmp.lt.s32.totalorder %v132_v21, 8  ;;  %s613_s21 = sshll.u32 %s873_s0, 3  ;;  %v843_v57 = vsel %vm430_vm14, 1.0, %v702_v6 }
   0xa   :  { %v167_v4 = vsel %vm160_vm0, %v166_v1, 0.0  ;;  %149 = vperm.xlu1 %670, %v147_v8   ;;  %v138_v9 = vld [vmem:[%s105_s17] sm:$0xff]  ;;  %v127_v24 = vstv %s613_s21  ;;  %s122_s26 = scalar_select %p121_p2, 1, 0 }
   0xb   :  { %168 = vadd.xlane.f32.xlu0 %v167_v4  ;;  %v161_v5 = vsel %vm160_vm0, %v159_v3, 0.0  ;;  %v128_v25 = vadd.s32 %v127_v24, %v125_v20 }
   0xc   :  { %s123_s28 = scvt.s32.f32 %s122_s26 }
   0xd   :  { %vm129_vm5 = vcmp.lt.s32.totalorder %v128_v25, 8 }
   0xe   :  { %140 = vperm.xlu1 %670, %v138_v9   ;;  %v819_v26 = vsel %vm129_vm5, 1.0, %v702_v6  ;;  %v255_v31 = vstv %s123_s28 }
   0xf   :  { %162 = vadd.xlane.f32.xlu0 %v161_v5  ;;  %v256_v33 = vmul.f32 %v620_v30, %v255_v31  ;;  %v336_v35 = vmul.f32 %v335_v32, %v255_v31 }
  0x11   :  { %v257_v37 = vsub.f32 1.0, %v256_v33  ;;  %v337_v41 = vsub.f32 %v334_v29, %v336_v35 }
  0x85   :  { %v150_v23 = vpop.permute.xlu1 %149 }
  0x86   :  { %vm151_vm3 = vcmp.eq.s32.totalorder %v150_v23, %v137_v22 }
  0x87   :  { %vm154_vm4 = vmand %vm151_vm3, %vm133_vm2 }
  0x88   :  { %643 = vmatpush3.msk.msra.mxu1 %vm154_vm4, %v705_v27 }
  0x89   :  { %647 = vmatprep.subr.mxu1 %v702_v6  ;;  %v141_v38 = vpop.permute.xlu1 %140 }
  0x8a   :  { %vm142_vm7 = vcmp.eq.s32.totalorder %v141_v38, %v137_v22 }
  0x8b   :  { %vm144_vm10 = vmand %vm142_vm7, %vm129_vm5 }
  0x8c   :  { %v616_v43 = vsel %vm144_vm10, 1.0, %v702_v6 }
  0x94   :  { %v169_v10 = vpop.xlane.xlu0 %168 }
  0x95   :  { %v170_v11 = vmax.f32 %v169_v10, 1e-16 }
  0x97   :  { %672 = vrsqrt.f32 %v170_v11 }
  0x98   :  { %v163_v12 = vpop.xlane.xlu0 %162 }
  0x99   :  { %v164_v13 = vmax.f32 %v163_v12, 1e-16 }
  0x9b   :  { %674 = vrsqrt.f32 %v164_v13 }
  0xa4   :  { %v673_v14 = vpop.eup %672 }
  0xa5   :  { %v173_v15 = vmul.f32 %v673_v14, %v158_v0 }
  0xa7   :  { %638 = vmatpush3.xpose.msk.msra.mxu0 %vm160_vm0, %v173_v15 }
  0xa8   :  { %v675_v16 = vpop.eup %674 }
  0xa9   :  { %v172_v17 = vmul.f32 %v675_v16, %v789_v2 }
  0xab   :  { %640 = vmatmul.mubr.msk.f32.vlgmr.msra.gmra.mxu0 %vm160_vm0, %v172_v17 }
 0x16b   :  { %v246_v34 = vpop.f32.mrf.mxu0 }
 0x16c   :  { %v250_v36 = vsub.f32 1.0, %v246_v34 }
 0x16d   :  { %v641_v39 = vpop.f32.mrf.mxu0 }
 0x16e   :  { %v251_v40 = vmax.f32 %v250_v36, 0.0 }
 0x170   :  { %v258_v42 = vmul.f32 %v257_v37, %v251_v40 }
 0x172   :  { %645 = vmatmul.mubr.msk.f32.vlgmr.msra.gmra.mxu1 %vm259_vm8, %v258_v42 }
 0x173   :  { %648 = vmatpush3.msk.msra.mxu1 %vm342_vm9, %v337_v41  ;;  %649 = vmatprep.mubr.msk.f32.mxu1 %vm703_vm1, %v702_v6 }
 0x176   :  { %650 = vmatmul.mubr.msk.f32.vlgmr.msra.gmra.mxu1 %vm338_vm11, %v616_v43 }
 0x232   :  { %v329_v44 = vpop.f32.mrf.mxu1 }
 0x234   :  { %v646_v45 = vpop.f32.mrf.mxu1 }
 0x236   :  { %v412_v46 = vpop.f32.mrf.mxu1 }
 0x237   :  { %v416_v47 = vmul.f32 %v412_v46, %v329_v44 }
 0x238   :  { %v651_v48 = vpop.f32.mrf.mxu1 }
 0x239   :  { %v417_v49 = vsel %vm338_vm11, %v416_v47, 0.0 }
 0x23a   :  { %418 = vadd.xlane.f32.xlu0 %v417_v49 }
 0x2c3   :  { %v419_v50 = vpop.xlane.xlu0 %418 }
 0x2c4   :  { %v420_v51 = vrot.slane %v419_v50, 4 }
 0x2c6   :  { %v421_v52 = vadd.f32 %v420_v51, %v419_v50 }
 0x2c8   :  { %v422_v53 = vrot.slane %v421_v52, 2 }
 0x2ca   :  { %v423_v54 = vadd.f32 %v422_v53, %v421_v52 }
 0x2cc   :  { %v424_v55 = vrot.slane %v423_v54, 1 }
 0x2ce   :  { %v425_v56 = vadd.f32 %v424_v55, %v423_v54 }
 0x2d0   :  { %657 = vpush %v425_v56 }
 0x301   :  { %s658_s7 = spop %657 }
 0x302   :  { %s427_s8 = smul.f32 0.017857144, %s658_s7 }
 0x303   :  { %438 = sbr.rel (%p626_p3) target bundleno = 1307 (0x51b), region = 37 }
 0x304   :  { %v433_v58 = vstv %s427_s8 }
 0x305   :  { %v434_v59 = vmul.f32 %v843_v57, %v433_v58 }
 0x307   :  { %435 = vst [vmem:[#allocation5] sm:$0xff] %v434_v59 }
 0x308   :  { %v439_v60 = vld [vmem:[%s117_s13] sm:$0xff]  ;;  %v706_v63 = vmov 0.0   ;;  %vm707_vm15 = vmmov 0   ;;  %vm458_vm1 = vcmask 7168  }
 0x309   :  { %v469_v61 = vld [vmem:[%s882_s9] sm:$0xf]  ;;  %v440_v62 = vsel %vm338_vm11, %v439_v60, -inf  ;;  %652 = vmatprep.subr.mxu0 %v706_v63  ;;  %654 = vmatprep.mubr.msk.f32.mxu0 %vm707_vm15, %v706_v63  ;;  %v452_v0 = vmul.f32 %v616_v43, %v439_v60 }
 0x30a   :  { %441 = vmax.xlane.f32.xlu0 %v440_v62  ;;  %653 = vmatpush3.msk.msra.mxu0 %vm342_vm9, %v469_v61 }
 0x30b   :  { %655 = vmatmul.mubr.msk.f32.vlgmr.msra.gmra.mxu0 %vm338_vm11, %v616_v43  ;;  %v453_v1 = vsel %vm338_vm11, %v452_v0, 0.0 }
 0x30c   :  { %454 = vadd.xlane.f32.xlu1 %v453_v1 }
 0x393   :  { %v442_v3 = vpop.xlane.xlu0 %441 }
 0x394   :  { %v443_v4 = vsub.f32 %v439_v60, %v442_v3 }
 0x395   :  { %v455_v17 = vpop.xlane.xlu1 %454 }
 0x396   :  { %v444_v5 = vmul.f32 1.442695, %v443_v4 }
 0x398   :  { %676 = vpow2.f32 %v444_v5 }
 0x3a5   :  { %v677_v6 = vpop.eup %676 }
 0x3a6   :  { %v446_v7 = vsel %vm338_vm11, %v677_v6, 0.0 }
 0x3a7   :  { %447 = vadd.xlane.f32.xlu0 %v446_v7 }
 0x3cb   :  { %v539_v8 = vpop.f32.mrf.mxu0 }
 0x3cc   :  { %v543_v9 = vsub.f32 %v789_v2, %v539_v8 }
 0x3cd   :  { %v656_v10 = vpop.f32.mrf.mxu0 }
 0x3ce   :  { %v544_v11 = vmul.f32 %v819_v26, %v543_v9 }
 0x3d0   :  { %v545_v12 = vmul.f32 %v544_v11, %v544_v11 }
 0x3d2   :  { %v546_v13 = vsel %vm160_vm0, %v545_v12, 0.0 }
 0x3d3   :  { %547 = vadd.xlane.f32.xlu0 %v546_v13 }
 0x430   :  { %v448_v14 = vpop.xlane.xlu0 %447 }
 0x431   :  { %678 = vlog2.f32 %v448_v14 }
 0x43e   :  { %v679_v15 = vpop.eup %678 }
 0x43f   :  { %v450_v16 = vmul.f32 0.6931472, %v679_v15 }
 0x441   :  { %v451_v18 = vadd.f32 %v450_v16, %v442_v3 }
 0x443   :  { %v456_v19 = vsub.f32 %v451_v18, %v455_v17 }
 0x445   :  { %v457_v20 = vmul.f32 %v819_v26, %v456_v19  ;;  %v556_v26 = vld [vmem:[#allocation5] sm:$0xff] }
 0x447   :  { %v459_v21 = vsel %vm458_vm1, %v457_v20, 0.0 }
 0x448   :  { %460 = vadd.xlane.f32.xlu1 %v459_v21 }
 0x45c   :  { %v548_v2 = vpop.xlane.xlu0 %547 }
 0x45d   :  { %v549_v22 = vrot.slane %v548_v2, 4 }
 0x45f   :  { %v550_v23 = vadd.f32 %v549_v22, %v548_v2 }
 0x461   :  { %v551_v24 = vrot.slane %v550_v23, 2 }
 0x463   :  { %v552_v29 = vadd.f32 %v551_v24, %v550_v23 }
 0x465   :  { %v553_v32 = vrot.slane %v552_v29, 1 }
 0x467   :  { %v554_v35 = vadd.f32 %v553_v32, %v552_v29 }
 0x4d1   :  { %v461_v25 = vpop.xlane.xlu1 %460 }
 0x4d2   :  { %v462_v27 = vrot.slane %v461_v25, 4 }
 0x4d4   :  { %v463_v28 = vadd.f32 %v462_v27, %v461_v25 }
 0x4d6   :  { %v464_v30 = vrot.slane %v463_v28, 2 }
 0x4d8   :  { %v465_v31 = vadd.f32 %v464_v30, %v463_v28 }
 0x4da   :  { %v466_v33 = vrot.slane %v465_v31, 1 }
 0x4dc   :  { %v467_v34 = vadd.f32 %v466_v33, %v465_v31 }
 0x4de   :  { %659 = vpush %v467_v34 }
 0x4df   :  { %661 = vpush %v554_v35 }
 0x50f   :  { %s660_s0 = spop %659 }
 0x510   :  { %s557_s1 = smul.f32 0.125, %s660_s0  ;;  %s662_s6 = spop %661 }
 0x511   :  { %s558_s9 = smul.f32 0.0625, %s662_s6 }
 0x513   :  { %s559_s27 = sadd.f32 %s558_s9, %s557_s1 }
 0x515   :  { %v560_v36 = vstv %s559_s27 }
 0x516   :  { %v561_v37 = vmul.f32 %v843_v57, %v560_v36 }
 0x518   :  { %v562_v38 = vadd.f32 %v561_v37, %v556_v26 }
 0x51a   :  { %563 = vst [vmem:[#allocation5] sm:$0xff] %v562_v38 }
 0x51b PF:  { %s708_s13 = smov [#allocation5]  }
 0x51c   :  { %s570_s18 = sshll.u32 %s708_s13, 4  ;;  %s571_s18 = int_to_ptr.vmem [resolvable:$true] %s570_s18 }
 0x51d   :  { %s680_s19 = scalar_lea.vmem %s571_s18, 128  ;;  %p685_p5 = scmp.lt.s32.totalorder %s571_s18, %s571_s18 }
 0x51e   :  { %p681_p4 = scmp.ne.s32.totalorder %s571_s18, %s680_s19  ;;  %p686_p6 = scmp.lt.s32.totalorder %s680_s19, %s680_s19 }
 0x520   :  { %p687_p7 = por %p686_p6, %p685_p5 }
 0x522   :  { %p688_p8 = pnand %p687_p7, %p681_p4 }
 0x524   :  { %691 = shalt.err (!%p688_p8)
}
 0x525   :  { %573 = dma.vmem_to_hbm [thread:$0]  %s571_s18, 128, %s883_s10, [#allocation6]  }
 0x526   :  { %700 = dma.done.wait [#allocation6], 128  }
 0x527   :  { %701 = vsyncadd [#allocation6], 4294967168 }
 0x528   :  { %577 = vsyncpa [#allocation6], 1 }

</bundles_post_ra>
